<compile_context>
chip_gen: v7x
topology: tpu7x:2x2x1
jax: 0.10.0
libtpu: 0.0.40
codegen_flags: <defaults>
</compile_context>

<pallas_src>
import numpy as np
import jax
import jax.numpy as jnp
from jax.experimental import pallas as pl
from jax.experimental.pallas import tpu as pltpu


_MAX_TILE_B = 256          # MXU-aligned; fits v5e/v6e/v7x scoped VMEM easily
_LANE = 128                # lane width -> lane-dense output padding
_NEG_PAD = -1e30           # padded-action logit bias; exp underflows to 0.0


def _round_up(n, m):
    return ((n + m - 1) // m) * m


# ----------------------------- Pallas kernels -----------------------------

def _softmax_epilogue(logits, logp_ref, probs_ref):
    """Stable softmax; writes normalized log-probs and probs (lane-dense)."""
    m = jnp.max(logits, axis=-1, keepdims=True)
    e = jnp.exp(logits - m)
    s = jnp.sum(e, axis=-1, keepdims=True)
    logp_ref[...] = logits - (m + jnp.log(s))
    probs_ref[...] = e * pl.reciprocal(s, approx=True)   # EUP, off VALU path


def _mlp_head_kernel(x_ref, w1_ref, b1_ref, w2_ref, b2_ref, logp_ref, probs_ref):
    # loopnav / teleportnav branch: Linear -> ReLU -> Linear -> softmax
    h = jnp.dot(x_ref[...], w1_ref[...],
                preferred_element_type=jnp.float32) + b1_ref[...]
    h = jnp.maximum(h, 0.0)
    logits = jnp.dot(h, w2_ref[...],
                     preferred_element_type=jnp.float32) + b2_ref[...]
    _softmax_epilogue(logits, logp_ref, probs_ref)


def _linear_head_kernel(x_ref, w_ref, b_ref, logp_ref, probs_ref):
    # plain-Linear branch: Linear -> softmax
    logits = jnp.dot(x_ref[...], w_ref[...],
                     preferred_element_type=jnp.float32) + b_ref[...]
    _softmax_epilogue(logits, logp_ref, probs_ref)


def _run_head(kernel, x, params, num_outputs, a_pad):
    """Single pallas_call over a batch grid; returns (log_probs, probs)."""
    B, d_in = x.shape
    tile_b = B if B <= _MAX_TILE_B else _MAX_TILE_B
    grid = (pl.cdiv(B, tile_b),)

    x_spec = pl.BlockSpec((tile_b, d_in), lambda i: (i, 0))
    # full-array, grid-invariant blocks -> weights stay resident in VMEM
    param_specs = [pl.BlockSpec(p.shape, lambda i: (0, 0)) for p in params]
    out_spec = pl.BlockSpec((tile_b, a_pad), lambda i: (i, 0))

    logp_pad, probs_pad = pl.pallas_call(
        kernel,
        out_shape=(jax.ShapeDtypeStruct((B, a_pad), jnp.float32),
                   jax.ShapeDtypeStruct((B, a_pad), jnp.float32)),
        grid=grid,
        in_specs=[x_spec] + param_specs,
        out_specs=(out_spec, out_spec),
        compiler_params=pltpu.CompilerParams(
            dimension_semantics=("parallel",)),
    )(x, *params)
    # drop the padded action lanes (cheap XLA slice)
    return logp_pad[:, :num_outputs], probs_pad[:, :num_outputs]


# ------------------------ distribution (JAX glue) ------------------------

class CustomFixedCategorical:
    """CustomFixedCategorical semantics on top of kernel outputs."""

    def __init__(self, log_probs, probs):
        # torch.distributions.Categorical(logits=...) stores NORMALIZED logits
        self.logits = log_probs
        self.probs = probs
        self._log_probs = log_probs

    def sample(self, key, sample_shape=()):
        shape = tuple(sample_shape) + self.logits.shape[:-1]
        s = jax.random.categorical(key, self.logits, axis=-1, shape=shape)
        return s[..., None]                       # unsqueeze(-1)

    def log_probs(self, actions):
        a = jnp.squeeze(actions, axis=-1)
        lp = jnp.take_along_axis(self._log_probs, a[..., None], axis=-1)[..., 0]
        return lp.reshape(actions.shape[0], -1).sum(-1)[..., None]

    def mode(self):
        return jnp.argmax(self.probs, axis=-1, keepdims=True)


# ------------------------------ module-ish --------------------------------

def _orthogonal(rng, rows, cols, gain):
    """Deterministic orthogonal init (nn.init.orthogonal_ semantics)."""
    a = rng.standard_normal((max(rows, cols), min(rows, cols)))
    q, r = np.linalg.qr(a)
    q = q * np.sign(np.diag(r))
    if rows < cols:
        q = q.T
    return (gain * q[:rows, :cols]).astype(np.float32)


class CategoricalNet:
    def __init__(self, num_inputs, num_outputs, task):
        self._task = task
        self.num_outputs = num_outputs
        self._a_pad = _round_up(num_outputs, _LANE)
        rng = np.random.default_rng(0)

        if task in ("loopnav", "teleportnav"):
            h = num_inputs // 2
            w1 = _orthogonal(rng, h, num_inputs, gain=0.01)       # torch [out, in]
            w2 = _orthogonal(rng, num_outputs, h, gain=0.01)
            # cache kernel-ready layouts ONCE (no per-call transpose/reshape)
            self.w1_t = jnp.asarray(w1.T)                          # [Din, Dhid]
            self.b1_r = jnp.zeros((1, h), jnp.float32)             # [1, Dhid]
            w2_t = np.zeros((h, self._a_pad), np.float32)          # [Dhid, A_pad]
            w2_t[:, :num_outputs] = w2.T
            self.w2_t = jnp.asarray(w2_t)
            b2 = np.full((1, self._a_pad), _NEG_PAD, np.float32)   # pad lanes -> -1e30
            b2[:, :num_outputs] = 0.0
            self.b2_r = jnp.asarray(b2)
            self._params = (self.w1_t, self.b1_r, self.w2_t, self.b2_r)
            self._kernel = _mlp_head_kernel
        else:
            w = _orthogonal(rng, num_outputs, num_inputs, gain=0.01)
            w_t = np.zeros((num_inputs, self._a_pad), np.float32)  # [Din, A_pad]
            w_t[:, :num_outputs] = w.T
            self.w_t = jnp.asarray(w_t)
            b = np.full((1, self._a_pad), _NEG_PAD, np.float32)
            b[:, :num_outputs] = 0.0
            self.b_r = jnp.asarray(b)
            self._params = (self.w_t, self.b_r)
            self._kernel = _linear_head_kernel

    def forward(self, x, obs=None):
        x = jnp.asarray(x, jnp.float32)
        logp, probs = _run_head(self._kernel, x, self._params,
                                self.num_outputs, self._a_pad)
        return CustomFixedCategorical(logp, probs)


# --------------------------------- main -----------------------------------

if __name__ == "__main__":
    B, num_inputs, num_outputs = 2, 32, 4
    key = jax.random.PRNGKey(0)
    kx, ks = jax.random.split(key)
    x = jax.random.normal(kx, (B, num_inputs), dtype=jnp.float32)
    obs = {}  # unused by forward, matching the reference signature

    net = CategoricalNet(num_inputs, num_outputs, task="loopnav")
    dist = net.forward(x, obs)

    logp = jax.block_until_ready(dist.logits)
    probs = jax.block_until_ready(dist.probs)
    mode = jax.block_until_ready(dist.mode())
    actions = jax.block_until_ready(dist.sample(ks))
    lp = jax.block_until_ready(dist.log_probs(actions))

    # sanity: compare against plain-JAX reference built from the cached layouts
    h_ref = jnp.maximum(x @ net.w1_t + net.b1_r, 0.0)
    logits_ref = h_ref @ net.w2_t[:, :num_outputs]   # real bias is 0
    logp_ref = jax.nn.log_softmax(logits_ref, axis=-1)
    probs_ref = jax.nn.softmax(logits_ref, axis=-1)

    assert jnp.allclose(logp, logp_ref, atol=1e-4), "log_probs mismatch"
    # approx reciprocal in the kernel -> slightly looser tolerance on probs
    assert jnp.allclose(probs, probs_ref, atol=1e-3), "probs mismatch"
    assert jnp.allclose(jnp.sum(probs, axis=-1), 1.0, atol=1e-3), "probs not normalized"
    assert mode.shape == (B, 1) and actions.shape == (B, 1) and lp.shape == (B, 1)

    print("KERNEL_OK")
</pallas_src>

<mosaic_0001>
module attributes {stable_mosaic.version = 11 : i64} {
  func.func @_mlp_head_kernel(%arg0: i32, %arg1: memref<2x32xf32, #tpu.memory_space<vmem>>, %arg2: memref<32x16xf32, #tpu.memory_space<vmem>>, %arg3: memref<1x16xf32, #tpu.memory_space<vmem>>, %arg4: memref<16x128xf32, #tpu.memory_space<vmem>>, %arg5: memref<1x128xf32, #tpu.memory_space<vmem>>, %arg6: memref<2x128xf32, #tpu.memory_space<vmem>>, %arg7: memref<2x128xf32, #tpu.memory_space<vmem>>) attributes {dimension_semantics = [#tpu.dimension_semantics<parallel>], iteration_bounds = array<i64: 1>, scalar_prefetch = 0 : i64, scratch_operands = 0 : i64, tpu.core_type = #tpu.core_type<tc>, window_params = [{transform_indices = @transform_0, window_bounds = array<i64: 2, 32>}, {pipeline_mode = #tpu.pipeline_mode<synchronous>, transform_indices = @transform_1, window_bounds = array<i64: 32, 16>}, {pipeline_mode = #tpu.pipeline_mode<synchronous>, transform_indices = @transform_2, window_bounds = array<i64: 1, 16>}, {pipeline_mode = #tpu.pipeline_mode<synchronous>, transform_indices = @transform_3, window_bounds = array<i64: 16, 128>}, {pipeline_mode = #tpu.pipeline_mode<synchronous>, transform_indices = @transform_4, window_bounds = array<i64: 1, 128>}, {transform_indices = @transform_5, window_bounds = array<i64: 2, 128>}, {transform_indices = @transform_6, window_bounds = array<i64: 2, 128>}]} {
    %c0 = arith.constant 0 : index
    %c0_0 = arith.constant 0 : index
    %0 = vector.load %arg1[%c0, %c0_0] : memref<2x32xf32, #tpu.memory_space<vmem>>, vector<2x32xf32>
    %c0_1 = arith.constant 0 : index
    %c0_2 = arith.constant 0 : index
    %1 = vector.load %arg2[%c0_1, %c0_2] : memref<32x16xf32, #tpu.memory_space<vmem>>, vector<32x16xf32>
    %cst = arith.constant dense<0.000000e+00> : vector<2x16xf32>
    %2 = tpu.matmul %0, %1, %cst {dimension_numbers = #tpu.dot_dimension_numbers<[1], [0], [0], [1], [0, 0, 1, 1], [], []>} : vector<2x32xf32>, vector<32x16xf32>, vector<2x16xf32> -> vector<2x16xf32>
    %c0_3 = arith.constant 0 : index
    %c0_4 = arith.constant 0 : index
    %3 = vector.load %arg3[%c0_3, %c0_4] : memref<1x16xf32, #tpu.memory_space<vmem>>, vector<1x16xf32>
    %4 = vector.broadcast %3 : vector<1x16xf32> to vector<2x16xf32>
    %5 = arith.addf %2, %4 : vector<2x16xf32>
    %cst_5 = arith.constant 0.000000e+00 : f32
    %6 = vector.broadcast %cst_5 : f32 to vector<2x16xf32>
    %7 = arith.maximumf %5, %6 : vector<2x16xf32>
    %c0_6 = arith.constant 0 : index
    %c0_7 = arith.constant 0 : index
    %8 = vector.load %arg4[%c0_6, %c0_7] : memref<16x128xf32, #tpu.memory_space<vmem>>, vector<16x128xf32>
    %cst_8 = arith.constant dense<0.000000e+00> : vector<2x128xf32>
    %9 = tpu.matmul %7, %8, %cst_8 {dimension_numbers = #tpu.dot_dimension_numbers<[1], [0], [0], [1], [0, 0, 1, 1], [], []>} : vector<2x16xf32>, vector<16x128xf32>, vector<2x128xf32> -> vector<2x128xf32>
    %c0_9 = arith.constant 0 : index
    %c0_10 = arith.constant 0 : index
    %10 = vector.load %arg5[%c0_9, %c0_10] : memref<1x128xf32, #tpu.memory_space<vmem>>, vector<1x128xf32>
    %11 = vector.broadcast %10 : vector<1x128xf32> to vector<2x128xf32>
    %12 = arith.addf %9, %11 : vector<2x128xf32>
    %cst_11 = arith.constant dense<0xFF800000> : vector<2xf32>
    %13 = vector.multi_reduction <maximumf>, %12, %cst_11 [1] : vector<2x128xf32> to vector<2xf32>
    %14 = vector.shape_cast %13 : vector<2xf32> to vector<2x1xf32>
    %15 = vector.broadcast %14 : vector<2x1xf32> to vector<2x128xf32>
    %16 = arith.subf %12, %15 : vector<2x128xf32>
    %17 = math.exp %16 : vector<2x128xf32>
    %cst_12 = arith.constant dense<0.000000e+00> : vector<2xf32>
    %18 = vector.multi_reduction <add>, %17, %cst_12 [1] : vector<2x128xf32> to vector<2xf32>
    %19 = vector.shape_cast %18 : vector<2xf32> to vector<2x1xf32>
    %20 = math.log %19 : vector<2x1xf32>
    %21 = arith.addf %14, %20 : vector<2x1xf32>
    %22 = vector.broadcast %21 : vector<2x1xf32> to vector<2x128xf32>
    %23 = arith.subf %12, %22 : vector<2x128xf32>
    %c0_13 = arith.constant 0 : index
    %c0_14 = arith.constant 0 : index
    %24 = vector.load %arg6[%c0_13, %c0_14] : memref<2x128xf32, #tpu.memory_space<vmem>>, vector<2x128xf32>
    tpu.vector_store %arg6[%c0_13, %c0_14], %23 {strides = array<i32>} : memref<2x128xf32, #tpu.memory_space<vmem>>, vector<2x128xf32>,
    %25 = tpu.reciprocal %19 {approx = true} : vector<2x1xf32> -> vector<2x1xf32>
    %26 = vector.broadcast %25 : vector<2x1xf32> to vector<2x128xf32>
    %27 = arith.mulf %17, %26 : vector<2x128xf32>
    %c0_15 = arith.constant 0 : index
    %c0_16 = arith.constant 0 : index
    %28 = vector.load %arg7[%c0_15, %c0_16] : memref<2x128xf32, #tpu.memory_space<vmem>>, vector<2x128xf32>
    tpu.vector_store %arg7[%c0_15, %c0_16], %27 {strides = array<i32>} : memref<2x128xf32, #tpu.memory_space<vmem>>, vector<2x128xf32>,
    return
  }
  func.func @transform_0(%arg0: i32) -> (i32, i32) {
    %c0_i32 = arith.constant 0 : i32
    %c0_i32_0 = arith.constant 0 : i32
    return %arg0, %c0_i32 : i32, i32
  }
  func.func @transform_1(%arg0: i32) -> (i32, i32) {
    %c0_i32 = arith.constant 0 : i32
    %c0_i32_0 = arith.constant 0 : i32
    %c0_i32_1 = arith.constant 0 : i32
    return %c0_i32, %c0_i32_0 : i32, i32
  }
  func.func @transform_2(%arg0: i32) -> (i32, i32) {
    %c0_i32 = arith.constant 0 : i32
    %c0_i32_0 = arith.constant 0 : i32
    %c0_i32_1 = arith.constant 0 : i32
    return %c0_i32, %c0_i32_0 : i32, i32
  }
  func.func @transform_3(%arg0: i32) -> (i32, i32) {
    %c0_i32 = arith.constant 0 : i32
    %c0_i32_0 = arith.constant 0 : i32
    %c0_i32_1 = arith.constant 0 : i32
    return %c0_i32, %c0_i32_0 : i32, i32
  }
  func.func @transform_4(%arg0: i32) -> (i32, i32) {
    %c0_i32 = arith.constant 0 : i32
    %c0_i32_0 = arith.constant 0 : i32
    %c0_i32_1 = arith.constant 0 : i32
    return %c0_i32, %c0_i32_0 : i32, i32
  }
  func.func @transform_5(%arg0: i32) -> (i32, i32) {
    %c0_i32 = arith.constant 0 : i32
    %c0_i32_0 = arith.constant 0 : i32
    return %arg0, %c0_i32 : i32, i32
  }
  func.func @transform_6(%arg0: i32) -> (i32, i32) {
    %c0_i32 = arith.constant 0 : i32
    %c0_i32_0 = arith.constant 0 : i32
    return %arg0, %c0_i32 : i32, i32
  }
}

</mosaic_0001>

<bundles_post_ra>
// kernel: tpu_custom_call.1
= control target key start
LH: loop header
LB: loop body
LE: loop exit
PB: predicated region body
PF: predicated region fallthrough
CT: control target
= control target key end

     0   :  { %12 = vsyncpa [#allocation3], 0  ;;  %v338_v3 = vmov 0.0|0.0   ;;  %vm339_vm0 = vmmov 0   ;;  %v340_v6 = vmov 0.0   ;;  %s436_s0 = inlined_call_operand.vmem [shape: f32[2,32], index: 0, kind: input, shape index: {}]   ;;  %s437_s1 = inlined_call_operand.vmem [shape: f32[32,16], index: 1, kind: input, shape index: {}]   ;;  %s438_s2 = inlined_call_operand.vmem [shape: f32[1,16], index: 2, kind: input, shape index: {}]   ;;  %s439_s3 = inlined_call_operand.vmem [shape: f32[16,128], index: 3, kind: input, shape index: {}]   ;;  %s440_s4 = inlined_call_operand.vmem [shape: f32[1,128], index: 4, kind: input, shape index: {}]   ;;  %s441_s5 = inlined_call_operand.hbm [shape: f32[2,128], index: 5, kind: output, shape index: {0}]   ;;  %s442_s6 = inlined_call_operand.hbm [shape: f32[2,128], index: 6, kind: output, shape index: {1}]  }
   0x1   :  { %v25_v0 = vld [vmem:[%s437_s1] sm:$0xff]  ;;  %v26_v1 = vld [vmem:[%s437_s1 + $0x8] sm:$0xff]  ;;  %v27_v2 = vld [vmem:[%s437_s1 + $0x10] sm:$0xff]  ;;  %270 = vmatprep.subr.bf16.mxu0 %v338_v3  ;;  %260 = vmatprep.mubr.msk.f32.mxu0 %vm339_vm0, %v340_v6 }
   0x2   :  { %v271_v4 = vpack.c.bf16 %v26_v1, %v25_v0  ;;  %v28_v5 = vld [vmem:[%s437_s1 + $0x18] sm:$0xff]  ;;  %276 = vmatprep.subr.bf16.mxu1 %v338_v3  ;;  %267 = vmatprep.mubr.msk.f32.mxu1 %vm339_vm0, %v340_v6 }
   0x3   :  { %13 = vsyncpa [#allocation5], 0  ;;  %v274_v7 = vpack.c.bf16 %v28_v5, %v27_v2  ;;  %v24_v8 = vld [vmem:[%s436_s0] sm:$0x3]  ;;  %vm36_vm1 = vcmask 261120   ;;  %v112_v10 = vld [vmem:[%s439_s3 + $0x8] sm:$0xff] }
   0x4   :  { %272 = vmatpush3.bf16.msra.mxu0 %v271_v4  ;;  %v111_v9 = vld [vmem:[%s439_s3] sm:$0xff]  ;;  %vm120_vm2 = vcmask 130048   ;;  %vm194_vm3 = vcmask 1041408  }
   0x5   :  { %273 = vmatprep.subr.bf16.mxu0 %v338_v3  ;;  %v277_v11 = vpack.c.bf16 %v112_v10, %v111_v9  ;;  %v240_v12 = vld [vmem:[%s438_s2] ss:$0 sm:$0xff]  ;;  %s341_s2 = smov [#allocation4]  }
   0x6   :  { %v242_v17 = vld [vmem:[%s440_s4] ss:$0 sm:$0xff]  ;;  %s228_s3 = sshll.u32 %s341_s2, 4  ;;  %s342_s4 = smov [#allocation2]   ;;  %s229_s3 = int_to_ptr.vmem [resolvable:$true] %s228_s3 }
   0x7   :  { %278 = vmatpush3.bf16.msra.mxu1 %v277_v11  ;;  %s218_s13 = sshll.u32 %s342_s4, 4  ;;  %s290_s14 = scalar_lea.vmem %s229_s3, 32  ;;  %s405_s13 = int_to_ptr.vmem [resolvable:$true] %s218_s13 }
   0x8   :  { %275 = vmatpush3.bf16.msra.mxu0 %v274_v7  ;;  %p291_p0 = scmp.ne.s32.totalorder %s229_s3, %s290_s14  ;;  %p295_p1 = scmp.lt.s32.totalorder %s229_s3, %s229_s3 }
   0x9   :  { %p296_p2 = scmp.lt.s32.totalorder %s290_s14, %s290_s14 }
   0xb   :  { %261 = vmatmul.mubr.msk.f32.vlgmr.msra.gmra.mrb[0].mxu0 %vm36_vm1, %v24_v8  ;;  %p297_p3 = por %p296_p2, %p295_p1 }
   0xd   :  { %p298_p4 = pnand %p297_p3, %p291_p0 }
  0xde   :  { %v106_v13 = vpop.f32.mrb[0].mxu0 }
  0xdf   :  { %v107_v14 = vadd.f32 %v240_v12, %v106_v13  ;;  %v262_v15 = vpop.f32.mrb[1].mxu0 }
  0xe1   :  { %v110_v16 = vmax.f32 %v107_v14, 0.0 }
  0xe3   :  { %268 = vmatmul.mubr.msk.f32.vlgmr.msra.gmra.mrb[0].mxu1 %vm120_vm2, %v110_v16 }
 0x1b6   :  { %v190_v18 = vpop.f32.mrb[0].mxu1 }
 0x1b7   :  { %v191_v19 = vadd.f32 %v242_v17, %v190_v18  ;;  %v269_v20 = vpop.f32.mrb[1].mxu1 }
 0x1b9   :  { %v195_v21 = vsel %vm194_vm3, %v191_v19, -inf }
 0x1ba   :  { %196 = vmax.xlane.f32.xlu0 %v195_v21 }
 0x247   :  { %v197_v22 = vpop.xlane.xlu0 %196 }
 0x248   :  { %v198_v23 = vsub.f32 %v191_v19, %v197_v22 }
 0x24a   :  { %v199_v24 = vmul.f32 1.442695, %v198_v23 }
 0x24c   :  { %284 = vpow2.f32 %v199_v24 }
 0x256   :  { %v285_v25 = vpop.eup %284 }
 0x257   :  { %v201_v26 = vsel %vm194_vm3, %v285_v25, 0.0 }
 0x258   :  { %202 = vadd.xlane.f32.xlu0 %v201_v26 }
 0x2e5   :  { %v203_v27 = vpop.xlane.xlu0 %202 }
 0x2e6   :  { %286 = vlog2.f32 %v203_v27 }
 0x2e7   :  { %288 = vrcp.f32 %v203_v27 }
 0x2f0   :  { %v287_v28 = vpop.eup %286 }
 0x2f1   :  { %v289_v29 = vpop.eup %288  ;;  %v205_v30 = vmul.f32 0.6931472, %v287_v28 }
 0x2f2   :  { %v210_v31 = vmul.f32 %v289_v29, %v285_v25 }
 0x2f3   :  { %v206_v32 = vadd.f32 %v205_v30, %v197_v22 }
 0x2f4   :  { %211 = vst [vmem:[#allocation4] sm:$0x3] %v210_v31 }
 0x2f5   :  { %v207_v33 = vsub.f32 %v191_v19, %v206_v32 }
 0x2f6   :  { %301 = shalt.err (!%p298_p4)
}
 0x2f7   :  { %s302_s17 = scalar_lea.hbm %s442_s6, 32 }
 0x2f8   :  { %p303_p5 = scmp.ne.s32.totalorder %s442_s6, %s302_s17  ;;  %p306_p6 = scmp.lt.u32.totalorder %s302_s17, %s442_s6 }
 0x2fa   :  { %p308_p7 = pnand %p306_p6, %p303_p5 }
 0x2fc   :  { %311 = shalt.err (!%p308_p7)
}
 0x2fd   :  { %231 = dma.vmem_to_hbm [thread:$0]  %s229_s3, 32, %s442_s6, [#allocation5]   ;;  %208 = vst [vmem:[#allocation2] sm:$0x3] %v207_v33 }
 0x2fe   :  { %s312_s24 = scalar_lea.vmem %s405_s13, 32  ;;  %p317_p9 = scmp.lt.s32.totalorder %s405_s13, %s405_s13 }
 0x2ff   :  { %p313_p8 = scmp.ne.s32.totalorder %s405_s13, %s312_s24  ;;  %p318_p10 = scmp.lt.s32.totalorder %s312_s24, %s312_s24 }
 0x301   :  { %p319_p11 = por %p318_p10, %p317_p9 }
 0x303   :  { %p320_p12 = pnand %p319_p11, %p313_p8 }
 0x305   :  { %323 = shalt.err (!%p320_p12)
}
 0x306   :  { %s324_s27 = scalar_lea.hbm %s441_s5, 32 }
 0x307   :  { %p325_p13 = scmp.ne.s32.totalorder %s441_s5, %s324_s27  ;;  %p328_p0 = scmp.lt.u32.totalorder %s324_s27, %s441_s5 }
 0x309   :  { %p330_p1 = pnand %p328_p0, %p325_p13 }
 0x30b   :  { %333 = shalt.err (!%p330_p1)
}
 0x30c   :  { %221 = dma.vmem_to_hbm [thread:$0]  %s405_s13, 32, %s441_s5, [#allocation3]  }
 0x30d   :  { %334 = dma.done.wait [#allocation3], 32  }
 0x30e   :  { %335 = vsyncadd [#allocation3], 4294967264 }
 0x30f   :  { %336 = dma.done.wait [#allocation5], 32  }
 0x310   :  { %337 = vsyncadd [#allocation5], 4294967264 }
 0x311   :  { %238 = vsyncpa [#allocation3], 1 }
 0x312   :  { %239 = vsyncpa [#allocation5], 1 }

</bundles_post_ra>
